<compile_context>
chip_gen: v7x
topology: tpu7x:2x2x1
jax: 0.10.0
libtpu: 0.0.40
codegen_flags: <defaults>
</compile_context>

<pallas_src>
import functools

import jax
import jax.numpy as jnp
from jax import lax
from jax.experimental import pallas as pl
from jax.experimental.pallas import tpu as pltpu

_LANES = 128
_TARGET_TILE_BYTES = 4 << 20      # per-input tile; 2 inputs x 2 buffers -> 16 MiB
_VMEM_LIMIT_BYTES = 32 << 20


def _sqdiff_partial_kernel(a_ref, b_ref, out_ref, *,
                           rows_total, tile_rows, tiles_per_chunk,
                           group_reduce, needs_mask):
    """Accumulate sum((a-b)^2) of this chunk's tiles into out_ref (resident)."""
    j = pl.program_id(1)

    @pl.when(j == 0)
    def _init():
        out_ref[...] = jnp.zeros_like(out_ref)

    # Hot loop is VPU-only: load, cast, sub, mul, cross-vreg adds.
    diff = a_ref[...].astype(jnp.float32) - b_ref[...].astype(jnp.float32)
    d2 = diff * diff

    if needs_mask:
        # Logical (unclamped) global tile index -> rows past the real extent
        # (ragged last tile or phantom tile of the core split) contribute 0.
        tile_idx = pl.program_id(0) * tiles_per_chunk + j
        row_start = tile_idx * tile_rows
        row_ids = row_start + lax.broadcasted_iota(jnp.int32, d2.shape, 0)
        d2 = jnp.where(row_ids < rows_total, d2, 0.0)

    tr, bc = d2.shape
    if group_reduce:
        # (tr, bc) -> (tr//8, 8, bc) sum over leading axis: pure VPU adds,
        # one vadd per input vreg, result is a single (8, bc) slab.
        part = d2.reshape(tr // 8, 8, bc).sum(axis=0)
    else:
        # Tiny single-tile fallback (tr < 8 or not a multiple of 8).
        part = d2.sum(axis=0, keepdims=True)

    out_ref[...] += part.reshape(out_ref.shape)


def capsule_loss(images, labels, classes, reconstructions):
    """Pallas implementation of CapsuleLoss.forward.

    images / reconstructions are unused (matches the PyTorch forward, whose
    reconstruction MSELoss is constructed in __init__ but never applied).
    """
    del images, reconstructions  # unused by the reference forward pass
    assert labels.shape == classes.shape
    batch_size = labels.shape[0]
    n = labels.size
    itemsize = jnp.dtype(labels.dtype).itemsize
    subl = max(8, 8 * (4 // itemsize))      # 8 f32 / 16 bf16 / 32 int8

    # Free 2-D view (contiguous reshape, no copy):
    #   lane-dense (rows, 128) slab when possible, else natural (B, C).
    if n % _LANES == 0:
        rows, cols = n // _LANES, _LANES
    else:
        rows, cols = batch_size, n // batch_size
    a2d = labels.reshape(rows, cols)
    b2d = classes.reshape(rows, cols)

    # Row-tile size: largest sublane-multiple tile under the VMEM target.
    if rows <= subl:
        tile_rows = rows                                   # full-extent block
    else:
        max_rows = max(subl, _TARGET_TILE_BYTES // (cols * itemsize))
        tile_rows = min(rows, max_rows)
        tile_rows = max(subl, (tile_rows // subl) * subl)

    num_tiles = (rows + tile_rows - 1) // tile_rows
    # Two chunks -> leading "parallel" axis shards across v7x's 2 TensorCores;
    # on v5e/v6e (1 TC) it simply runs serially.
    num_chunks = 2 if num_tiles >= 2 else 1
    tiles_per_chunk = (num_tiles + num_chunks - 1) // num_chunks

    group_reduce = (tile_rows % 8 == 0)
    acc_rows = 8 if group_reduce else 1
    needs_mask = (num_tiles * tile_rows != rows) or \
                 (num_chunks * tiles_per_chunk != num_tiles)

    last_tile = num_tiles - 1
    if num_chunks * tiles_per_chunk == num_tiles:
        def in_map(i, j):
            return (i * tiles_per_chunk + j, 0)
    else:
        # Phantom tiles of the split are clamped to a valid block (the mask
        # zeroes their contribution via the unclamped logical index).
        def in_map(i, j):
            return (jnp.minimum(i * tiles_per_chunk + j, last_tile), 0)

    kernel = functools.partial(
        _sqdiff_partial_kernel,
        rows_total=rows, tile_rows=tile_rows, tiles_per_chunk=tiles_per_chunk,
        group_reduce=group_reduce, needs_mask=needs_mask)

    partials = pl.pallas_call(
        kernel,
        out_shape=jax.ShapeDtypeStruct((num_chunks, acc_rows, cols), jnp.float32),
        grid=(num_chunks, tiles_per_chunk),
        in_specs=[
            pl.BlockSpec((tile_rows, cols), in_map),
            pl.BlockSpec((tile_rows, cols), in_map),
        ],
        out_specs=pl.BlockSpec((1, acc_rows, cols), lambda i, j: (i, 0, 0)),
        compiler_params=pltpu.CompilerParams(
            dimension_semantics=("parallel", "arbitrary"),
            vmem_limit_bytes=_VMEM_LIMIT_BYTES,
        ),
        cost_estimate=pl.CostEstimate(
            flops=3 * n,
            transcendentals=0,
            bytes_accessed=2 * n * itemsize + num_chunks * acc_rows * cols * 4,
        ),
    )(a2d, b2d)

    # Tiny epilogue: combine per-chunk partials, normalize by batch, sqrt.
    return jnp.sqrt(jnp.sum(partials) / batch_size)


def _reference(labels, classes):
    loss = jnp.sum((labels.astype(jnp.float32) - classes.astype(jnp.float32)) ** 2)
    return jnp.sqrt(loss / labels.shape[0])


if __name__ == "__main__":
    key = jax.random.PRNGKey(0)
    k1, k2, k3, k4, k5, k6, k7, k8 = jax.random.split(key, 8)

    # --- Small case matching the module's typical shapes -------------------
    batch, num_classes = 2, 16
    images = jax.random.normal(k1, (batch, 4, 16, 16), dtype=jnp.float32)  # unused
    labels = jax.nn.one_hot(
        jax.random.randint(k2, (batch,), 0, num_classes), num_classes
    ).astype(jnp.float32)
    classes = jax.nn.softmax(
        jax.random.normal(k3, (batch, num_classes), dtype=jnp.float32), axis=-1
    )
    reconstructions = jax.random.normal(k4, (batch, 4 * 16 * 16), dtype=jnp.float32)  # unused

    loss = capsule_loss(images, labels, classes, reconstructions)
    jax.block_until_ready(loss)
    ref = _reference(labels, classes)
    assert jnp.allclose(loss, ref, rtol=1e-5, atol=1e-5), (loss, ref)

    # --- Larger case: lane-dense slab path, 2 chunks, masked ragged tile ---
    b2, c2 = 64, 2050  # 64*2050 = 1025*128 -> lane-dense view with ragged rows
    labels_big = jax.random.normal(k5, (b2, c2), dtype=jnp.float32)
    classes_big = jax.random.normal(k6, (b2, c2), dtype=jnp.float32)
    loss_big = capsule_loss(None, labels_big, classes_big, None)
    jax.block_until_ready(loss_big)
    ref_big = _reference(labels_big, classes_big)
    assert jnp.allclose(loss_big, ref_big, rtol=1e-4, atol=1e-5), (loss_big, ref_big)

    # --- Ragged case: n % 128 != 0 -> natural (B, C) view, masked rows ------
    b3, c3 = 10, 33
    labels_r = jax.random.normal(k7, (b3, c3), dtype=jnp.float32)
    classes_r = jax.random.normal(k8, (b3, c3), dtype=jnp.float32)
    loss_r = capsule_loss(None, labels_r, classes_r, None)
    jax.block_until_ready(loss_r)
    ref_r = _reference(labels_r, classes_r)
    assert jnp.allclose(loss_r, ref_r, rtol=1e-5, atol=1e-5), (loss_r, ref_r)

    print("KERNEL_OK")
</pallas_src>

<mosaic_0001>
module attributes {stable_mosaic.version = 11 : i64} {
  func.func @_sqdiff_partial_kernel(%arg0: i32, %arg1: i32, %arg2: memref<2x16xf32, #tpu.memory_space<vmem>>, %arg3: memref<2x16xf32, #tpu.memory_space<vmem>>, %arg4: memref<1x1x16xf32, #tpu.memory_space<vmem>>) attributes {dimension_semantics = [#tpu.dimension_semantics<parallel>, #tpu.dimension_semantics<arbitrary>], iteration_bounds = array<i64: 1, 1>, scalar_prefetch = 0 : i64, scratch_operands = 0 : i64, tpu.core_type = #tpu.core_type<tc>, window_params = [{transform_indices = @transform_0, window_bounds = array<i64: 2, 16>}, {transform_indices = @transform_1, window_bounds = array<i64: 2, 16>}, {transform_indices = @transform_2, window_bounds = array<i64: 1, 1, 16>}]} {
    %c0_i32 = arith.constant 0 : i32
    %0 = arith.cmpi eq, %arg1, %c0_i32 : i32
    %1 = arith.extui %0 : i1 to i32
    %c0_i32_0 = arith.constant 0 : i32
    %2 = arith.cmpi ne, %1, %c0_i32_0 : i32
    scf.if %2 {
      %cst_10 = arith.constant 0.000000e+00 : f32
      %13 = vector.broadcast %cst_10 : f32 to vector<1x1x16xf32>
      %c0_11 = arith.constant 0 : index
      %c0_12 = arith.constant 0 : index
      %c0_13 = arith.constant 0 : index
      %14 = vector.load %arg4[%c0_11, %c0_12, %c0_13] : memref<1x1x16xf32, #tpu.memory_space<vmem>>, vector<1x1x16xf32>
      tpu.vector_store %arg4[%c0_11, %c0_12, %c0_13], %13 {strides = array<i32>} : memref<1x1x16xf32, #tpu.memory_space<vmem>>, vector<1x1x16xf32>,
    } else {
    }
    %c0 = arith.constant 0 : index
    %c0_1 = arith.constant 0 : index
    %3 = vector.load %arg2[%c0, %c0_1] : memref<2x16xf32, #tpu.memory_space<vmem>>, vector<2x16xf32>
    %c0_2 = arith.constant 0 : index
    %c0_3 = arith.constant 0 : index
    %4 = vector.load %arg3[%c0_2, %c0_3] : memref<2x16xf32, #tpu.memory_space<vmem>>, vector<2x16xf32>
    %5 = arith.subf %3, %4 : vector<2x16xf32>
    %6 = arith.mulf %5, %5 : vector<2x16xf32>
    %cst = arith.constant dense<0.000000e+00> : vector<16xf32>
    %7 = vector.multi_reduction <add>, %6, %cst [0] : vector<2x16xf32> to vector<16xf32>
    %8 = vector.shape_cast %7 : vector<16xf32> to vector<1x16xf32>
    %c0_4 = arith.constant 0 : index
    %c0_5 = arith.constant 0 : index
    %c0_6 = arith.constant 0 : index
    %9 = vector.load %arg4[%c0_4, %c0_5, %c0_6] : memref<1x1x16xf32, #tpu.memory_space<vmem>>, vector<1x1x16xf32>
    %10 = vector.shape_cast %8 : vector<1x16xf32> to vector<1x1x16xf32>
    %11 = arith.addf %9, %10 : vector<1x1x16xf32>
    %c0_7 = arith.constant 0 : index
    %c0_8 = arith.constant 0 : index
    %c0_9 = arith.constant 0 : index
    %12 = vector.load %arg4[%c0_7, %c0_8, %c0_9] : memref<1x1x16xf32, #tpu.memory_space<vmem>>, vector<1x1x16xf32>
    tpu.vector_store %arg4[%c0_7, %c0_8, %c0_9], %11 {strides = array<i32>} : memref<1x1x16xf32, #tpu.memory_space<vmem>>, vector<1x1x16xf32>,
    return
  }
  func.func @transform_0(%arg0: i32, %arg1: i32) -> (i32, i32) {
    %c1_i32 = arith.constant 1 : i32
    %0 = arith.muli %arg0, %c1_i32 : i32
    %1 = arith.addi %0, %arg1 : i32
    %c0_i32 = arith.constant 0 : i32
    %c0_i32_0 = arith.constant 0 : i32
    return %1, %c0_i32 : i32, i32
  }
  func.func @transform_1(%arg0: i32, %arg1: i32) -> (i32, i32) {
    %c1_i32 = arith.constant 1 : i32
    %0 = arith.muli %arg0, %c1_i32 : i32
    %1 = arith.addi %0, %arg1 : i32
    %c0_i32 = arith.constant 0 : i32
    %c0_i32_0 = arith.constant 0 : i32
    return %1, %c0_i32 : i32, i32
  }
  func.func @transform_2(%arg0: i32, %arg1: i32) -> (i32, i32, i32) {
    %c0_i32 = arith.constant 0 : i32
    %c0_i32_0 = arith.constant 0 : i32
    %c0_i32_1 = arith.constant 0 : i32
    return %arg0, %c0_i32, %c0_i32_0 : i32, i32, i32
  }
}

</mosaic_0001>

<bundles_post_ra>
// kernel: tpu_custom_call.1
= control target key start
LH: loop header
LB: loop body
LE: loop exit
PB: predicated region body
PF: predicated region fallthrough
CT: control target
= control target key end

     0   :  { %7 = vsyncpa [#allocation3], 0  ;;  %s186_s0 = inlined_call_operand.hbm [shape: f32[2,16], index: 0, kind: input, shape index: {}]   ;;  %s187_s1 = inlined_call_operand.vmem [shape: f32[2,16], index: 1, kind: input, shape index: {}]   ;;  %s188_s2 = inlined_call_operand.hbm [shape: f32[1,1,16], index: 2, kind: output, shape index: {}]  }
   0x1   :  { %8 = vsyncpa [#allocation4], 0  ;;  %s139_s9 = smov [#allocation2]   ;;  %s91_s13 = scalar_lea.hbm %s186_s0, 32 }
   0x2   :  { %s18_s10 = sshll.u32 %s139_s9, 4  ;;  %p92_p0 = scmp.ne.s32.totalorder %s186_s0, %s91_s13  ;;  %s19_s10 = int_to_ptr.vmem [resolvable:$true] %s18_s10 }
   0x3   :  { %p95_p1 = scmp.lt.u32.totalorder %s91_s13, %s186_s0 }
   0x5   :  { %p97_p2 = pnand %p95_p1, %p92_p0 }
   0x7   :  { %100 = shalt.err (!%p97_p2)
}
   0x8   :  { %s101_s18 = scalar_lea.vmem %s19_s10, 32  ;;  %p106_p4 = scmp.lt.s32.totalorder %s19_s10, %s19_s10 }
   0x9   :  { %p102_p3 = scmp.ne.s32.totalorder %s19_s10, %s101_s18  ;;  %p107_p5 = scmp.lt.s32.totalorder %s101_s18, %s101_s18 }
   0xb   :  { %p108_p6 = por %p107_p5, %p106_p4 }
   0xd   :  { %p109_p7 = pnand %p108_p6, %p102_p3 }
   0xf   :  { %112 = shalt.err (!%p109_p7)
}
  0x10   :  { %21 = dma.hbm_to_vmem [thread:$0]  %s186_s0, 32, %s19_s10, [#allocation3]  }
  0x11   :  { %135 = dma.done.wait [#allocation3], 32  }
  0x12   :  { %136 = vsyncadd [#allocation3], 4294967264  ;;  %vm49_vm0 = vcmask 122880   ;;  %v140_v0 = vmov 0.0   ;;  %v51_v1 = vld [vmem:[#allocation2] sm:$0x3] }
  0x13   :  { %50 = vst.msk [vmem:[#allocation5] sm:$0x1] %vm49_vm0, %v140_v0  ;;  %v52_v2 = vld [vmem:[%s187_s1] sm:$0x3]  ;;  %vm55_vm1 = vcmask 123904   ;;  %s141_s0 = smov [#allocation5]  }
  0x14   :  { %v53_v3 = vsub.f32 %v51_v1, %v52_v2  ;;  %s73_s23 = sshll.u32 %s141_s0, 4  ;;  %s74_s23 = int_to_ptr.vmem [resolvable:$true] %s73_s23 }
  0x15   :  { %s113_s24 = scalar_lea.vmem %s74_s23, 16  ;;  %s117_s1 = scalar_lea.vmem %s74_s23, 32 }
  0x16   :  { %v54_v4 = vmul.f32 %v53_v3, %v53_v3  ;;  %p114_p8 = scmp.ne.s32.totalorder %s74_s23, %s113_s24  ;;  %p118_p9 = scmp.lt.s32.totalorder %s74_s23, %s74_s23 }
  0x17   :  { %p119_p10 = scmp.lt.s32.totalorder %s117_s1, %s113_s24 }
  0x18   :  { %v56_v5 = vsel %vm55_vm1, %v54_v4, 0.0 }
  0x19   :  { %v57_v6 = vrot.slane %v56_v5, 4  ;;  %p120_p11 = por %p119_p10, %p118_p9 }
  0x1a   :  { %v63_v11 = vld [vmem:[#allocation5] sm:$0x1] }
  0x1b   :  { %v58_v7 = vadd.f32 %v57_v6, %v56_v5  ;;  %p121_p12 = pnand %p120_p11, %p114_p8 }
  0x1d   :  { %v59_v8 = vrot.slane %v58_v7, 2 }
  0x1f   :  { %v60_v9 = vadd.f32 %v59_v8, %v58_v7 }
  0x21   :  { %v61_v10 = vrot.slane %v60_v9, 1 }
  0x23   :  { %v62_v12 = vadd.f32 %v61_v10, %v60_v9 }
  0x25   :  { %v64_v13 = vadd.f32 %v63_v11, %v62_v12 }
  0x27   :  { %66 = vst.msk [vmem:[#allocation5] sm:$0x1] %vm49_vm0, %v64_v13 }
  0x28   :  { %124 = shalt.err (!%p121_p12)
}
  0x29   :  { %s125_s27 = scalar_lea.hbm %s188_s2, 16 }
  0x2a   :  { %p126_p13 = scmp.ne.s32.totalorder %s188_s2, %s125_s27  ;;  %p129_p0 = scmp.lt.u32.totalorder %s125_s27, %s188_s2 }
  0x2c   :  { %p131_p1 = pnand %p129_p0, %p126_p13 }
  0x2e   :  { %134 = shalt.err (!%p131_p1)
}
  0x2f   :  { %76 = dma.vmem_to_hbm [thread:$0]  %s74_s23, 16, %s188_s2, [#allocation4]  }
  0x30   :  { %137 = dma.done.wait [#allocation4], 16  }
  0x31   :  { %138 = vsyncadd [#allocation4], 4294967280 }
  0x32   :  { %80 = vsyncpa [#allocation3], 1 }
  0x33   :  { %81 = vsyncpa [#allocation4], 1 }

</bundles_post_ra>
